<compile_context>
chip_gen: v5e
topology: v5e:2x2
jax: 0.10.0
libtpu: 0.0.40
codegen_flags: <defaults>
</compile_context>

<pallas_src>
import functools
import math

import numpy as np
import jax
import jax.numpy as jnp
from jax.experimental import pallas as pl
from jax.experimental.pallas import tpu as pltpu

# -------------------- small, module-consistent config --------------------
DIM = 32            # config.dim
N_HEADS = 4         # config.n_heads
N_SPLATS = 4        # config.n_splats_per_head
HEAD_DIM = DIM // N_HEADS
MOVEMENT_SCALE = 0.08
TEMPERATURE_INIT = 1.0
SCALE_INIT = 0.5
LN_EPS = 1e-5       # torch.nn.LayerNorm default eps

# MXU operand dtype.  On v6e/v7x, jnp.bfloat16 is the right production choice
# once row batching makes M large (accumulation stays f32 via
# preferred_element_type); kept f32 here so the toy-size run stays within the
# 2e-4 tolerance against the f32 reference.
MXU_DTYPE = jnp.float32


# -------------------- fused kernel --------------------
def _gsa_kernel(x_ref, gamma_ref, beta_ref, w_qkv_t_ref, w_out_t_ref,
                dist_rhs_ref, q_bias_ref, k_bias_ref, out_ref,
                *, bt, seq, dim, n_heads, n_splats, head_dim):
    # x_ref/out_ref: (R, D) with R = bt*seq; gamma/beta: (1, D)
    # w_qkv_t: (D, 3D); w_out_t: (D, D); dist_rhs: (2D, H*S)
    # q_bias/k_bias: (1, H*S)
    f32 = jnp.float32
    R = bt * seq
    HS = n_heads * n_splats

    x = x_ref[...]                                           # (R, D)

    # ---- LayerNorm (f32 reductions) ----
    mean = jnp.mean(x, axis=-1, keepdims=True)
    var = jnp.mean((x - mean) ** 2, axis=-1, keepdims=True)
    normed = (x - mean) * jax.lax.rsqrt(var + LN_EPS)
    normed = normed * gamma_ref[...] + beta_ref[...]         # (R, D)

    # ---- fused QKV projection: one (R, D) @ (D, 3D) ----
    qkv = jnp.dot(normed.astype(MXU_DTYPE), w_qkv_t_ref[...],
                  preferred_element_type=f32)                # (R, 3D)
    q = qkv[:, :dim]                                         # head-major columns
    k = qkv[:, dim:2 * dim]
    v = qkv[:, 2 * dim:]

    # ---- all splat distance-exponents (q & k sides, all heads) in ONE matmul ----
    # lhs = [[q*q | q], [k*k | k]] (2R, 2D); dist_rhs = [[head_ones * ninv],
    # [-2 * blockdiag(centers^T) * ninv]] (2D, H*S)
    #   => lhs @ dist_rhs = (x_sq - 2 x.c) * ninv per (head, splat) column.
    lhs = jnp.concatenate(
        [jnp.concatenate([q * q, q], axis=-1),
         jnp.concatenate([k * k, k], axis=-1)], axis=0)      # (2R, 2D)
    e = jnp.dot(lhs.astype(MXU_DTYPE), dist_rhs_ref[...],
                preferred_element_type=f32)                  # (2R, H*S)
    # ||c||^2*ninv (+ log(amp/temperature) on the q side) folded into the bias.
    qwa = jnp.exp(e[:R] + q_bias_ref[...])                   # (R, H*S)
    kw = jnp.exp(e[R:] + k_bias_ref[...])                    # (R, H*S)

    # ---- per-head attention, batched over the bt batch elements of this step ----
    # TODO(synk): if T scales far beyond toy sizes, switch to a key-tiled
    # online-softmax here and raise vmem_limit_bytes (v5e 16 MiB / v7x 32 MiB
    # scoped defaults).
    qwa_b = qwa.reshape(bt, seq, HS)
    kw_b = kw.reshape(bt, seq, HS)
    v_b = v.reshape(bt, seq, dim)
    heads = []
    for h in range(n_heads):                                 # H=4, fully unrolled
        s0 = h * n_splats
        d0 = h * head_dim
        logits = jnp.einsum(
            'bqs,bks->bqk',
            qwa_b[:, :, s0:s0 + n_splats].astype(MXU_DTYPE),
            kw_b[:, :, s0:s0 + n_splats].astype(MXU_DTYPE),
            preferred_element_type=f32)                      # (bt, T, T)
        m = jnp.max(logits, axis=-1, keepdims=True)
        p = jnp.exp(logits - m)
        inv_l = pl.reciprocal(jnp.sum(p, axis=-1, keepdims=True), approx=True)
        oh = jnp.einsum('bqk,bkd->bqd', p.astype(MXU_DTYPE),
                        v_b[:, :, d0:d0 + head_dim].astype(MXU_DTYPE),
                        preferred_element_type=f32) * inv_l  # (bt, T, hd)
        heads.append(oh)

    # ---- single fused out-projection + residual; one (R, D) store per step ----
    attn_out = jnp.concatenate(heads, axis=-1).reshape(R, dim)   # (R, D)
    # TODO(synk): nn.Dropout(0.1) is identity in eval mode; not applied here.
    out_ref[...] = x + jnp.dot(attn_out.astype(MXU_DTYPE), w_out_t_ref[...],
                               preferred_element_type=f32)


# -------------------- block-batch selection --------------------
def _pick_block_batch(B, T, row_target=256):
    """Rows per grid step: big enough to fill MXU sublanes / amortize the
    ~0.35us per-step pipeline cost, small enough to keep >= 2 grid steps
    (v7x megacore) and modest VMEM.  Partial row blocks must be multiples of
    8 rows (sublane rule); the full batch is always a legal fallback."""
    for bt in range(B, 0, -1):
        if B % bt:
            continue
        rows = bt * T
        if rows != B * T and rows % 8 != 0:
            continue
        if rows <= max(row_target, T) and (B // bt >= 2 or B == 1):
            return bt
    return B


# -------------------- wrapper --------------------
def gsa_layer_forward(x, params):
    B, T, D = x.shape
    assert D == DIM
    H, S, hd = N_HEADS, N_SPLATS, HEAD_DIM
    f32 = jnp.float32

    gamma = params["ln_gamma"].reshape(1, D).astype(f32)
    beta = params["ln_beta"].reshape(1, D).astype(f32)
    w_qkv_t = params["w_qkv"].T.astype(MXU_DTYPE)            # (D, 3D)
    w_out_t = params["w_out"].T.astype(MXU_DTYPE)            # (D, D)

    # ---- tiny (H, S) parameter transforms: plain-JAX glue ----
    centers = (params["splat_centers"]
               + params["splat_deltas"] * jax.nn.sigmoid(params["movement_scale"]) * 0.2)
    scales = jnp.clip(jnp.exp(params["splat_log_scales"]), 0.01, 2.0)      # (H, S)
    amps = jnp.clip(jnp.exp(params["splat_log_amplitudes"]), 1e-6, 10.0)   # (H, S)
    temp = jnp.clip(params["temperature"], 0.1, 10.0)

    ninv = (-0.5 / (scales ** 2 + 1e-8)).reshape(1, H * S).astype(f32)     # (1, HS)
    c_sq = jnp.sum(centers ** 2, axis=-1).reshape(1, H * S).astype(f32)    # (1, HS)
    k_bias = c_sq * ninv                                                   # (1, HS)
    # amplitude and 1/temperature folded into the q-side exponent (exact:
    # amp/temp > 0 after clipping).
    q_bias = k_bias + jnp.log(amps / temp).reshape(1, H * S).astype(f32)

    # block-diagonal RHS for the single splat-distance matmul:
    #   rows [0, D)  : per-head indicator * ninv  (contracts x*x -> x_sq*ninv)
    #   rows [D, 2D) : -2 * blockdiag(centers^T) * ninv
    eye_h = jnp.eye(H, dtype=f32)                            # (H, H)
    cb = jnp.transpose(centers, (0, 2, 1)).astype(f32)       # (H, hd, S)
    centers_bd = (eye_h[:, None, :, None] * cb[:, :, None, :]).reshape(D, H * S)
    head_ones = (eye_h[:, None, :, None]
                 * jnp.ones((1, hd, 1, S), f32)).reshape(D, H * S)
    dist_rhs = jnp.concatenate([head_ones * ninv, -2.0 * centers_bd * ninv],
                               axis=0).astype(MXU_DTYPE)     # (2D, H*S)

    Bt = _pick_block_batch(B, T)
    R = Bt * T
    x2 = x.reshape(B * T, D).astype(f32)   # contiguous -> metadata-only reshape

    kernel = functools.partial(_gsa_kernel, bt=Bt, seq=T, dim=D,
                               n_heads=H, n_splats=S, head_dim=hd)

    out = pl.pallas_call(
        kernel,
        grid=(B // Bt,),
        in_specs=[
            pl.BlockSpec((R, D), lambda i: (i, 0)),          # x row block
            pl.BlockSpec((1, D), lambda i: (0, 0)),          # gamma    (resident)
            pl.BlockSpec((1, D), lambda i: (0, 0)),          # beta     (resident)
            pl.BlockSpec((D, 3 * D), lambda i: (0, 0)),      # w_qkv^T  (resident)
            pl.BlockSpec((D, D), lambda i: (0, 0)),          # w_out^T  (resident)
            pl.BlockSpec((2 * D, H * S), lambda i: (0, 0)),  # dist_rhs (resident)
            pl.BlockSpec((1, H * S), lambda i: (0, 0)),      # q-side exponent bias
            pl.BlockSpec((1, H * S), lambda i: (0, 0)),      # k-side exponent bias
        ],
        out_specs=pl.BlockSpec((R, D), lambda i: (i, 0)),
        out_shape=jax.ShapeDtypeStruct((B * T, D), f32),
        compiler_params=pltpu.CompilerParams(
            dimension_semantics=("parallel",)),
    )(x2, gamma, beta, w_qkv_t, w_out_t, dist_rhs, q_bias, k_bias)
    return out.reshape(B, T, D)


# -------------------- deterministic parameter init --------------------
def init_params(key):
    H, S, hd, D = N_HEADS, N_SPLATS, HEAD_DIM, DIM
    ks = jax.random.split(key, 5)

    def xavier_uniform(k, shape, gain):
        fan_out, fan_in = shape
        bound = gain * math.sqrt(6.0 / (fan_in + fan_out))
        return jax.random.uniform(k, shape, jnp.float32, -bound, bound)

    return {
        "splat_centers": jax.random.normal(ks[0], (H, S, hd), jnp.float32) * 0.2,
        "splat_deltas": jnp.zeros((H, S, hd), jnp.float32),
        "splat_log_scales": jax.random.normal(ks[1], (H, S), jnp.float32) * 0.2
                            + math.log(SCALE_INIT),
        "splat_log_amplitudes": jax.random.normal(ks[2], (H, S), jnp.float32) * 0.1 - 0.5,
        "movement_scale": jnp.float32(MOVEMENT_SCALE),
        "temperature": jnp.float32(TEMPERATURE_INIT),
        "w_qkv": xavier_uniform(ks[3], (3 * D, D), 0.5),
        "w_out": xavier_uniform(ks[4], (D, D), 0.5),
        "ln_gamma": jnp.ones((D,), jnp.float32),
        "ln_beta": jnp.zeros((D,), jnp.float32),
    }


# -------------------- pure-JAX reference (mirrors the torch forward) --------------------
def gsa_layer_reference(x, params):
    B, T, D = x.shape
    H, S, hd = N_HEADS, N_SPLATS, HEAD_DIM
    mean = jnp.mean(x, axis=-1, keepdims=True)
    var = jnp.mean((x - mean) ** 2, axis=-1, keepdims=True)
    normed = (x - mean) / jnp.sqrt(var + LN_EPS) * params["ln_gamma"] + params["ln_beta"]
    qkv = (normed @ params["w_qkv"].T).reshape(B, T, 3, H, hd)
    q, k, v = qkv[:, :, 0], qkv[:, :, 1], qkv[:, :, 2]          # (B, T, H, hd)
    centers = (params["splat_centers"]
               + params["splat_deltas"] * jax.nn.sigmoid(params["movement_scale"]) * 0.2)
    scales = jnp.clip(jnp.exp(params["splat_log_scales"]), 0.01, 2.0)
    amps = jnp.clip(jnp.exp(params["splat_log_amplitudes"]), 1e-6, 10.0)
    q_d = jnp.sum((q[:, :, :, None, :] - centers[None, None]) ** 2, axis=-1)  # (B,T,H,S)
    k_d = jnp.sum((k[:, :, :, None, :] - centers[None, None]) ** 2, axis=-1)
    denom = scales ** 2 + 1e-8
    q_w = jnp.exp(-0.5 * q_d / denom)
    k_w = jnp.exp(-0.5 * k_d / denom)
    logits = jnp.einsum("bihs,bjhs,hs->bijh", q_w, k_w, amps)   # (B,Tq,Tk,H)
    temp = jnp.clip(params["temperature"], 0.1, 10.0)
    attn = jax.nn.softmax(logits / temp, axis=2)
    out = jnp.einsum("bijh,bjhd->bihd", attn, v).reshape(B, T, D)
    return x + out @ params["w_out"].T


if __name__ == "__main__":
    key = jax.random.PRNGKey(0)
    pkey, xkey = jax.random.split(key)
    params = init_params(pkey)

    B, T = 2, 8
    x = jax.random.normal(xkey, (B, T, DIM), jnp.float32)

    out = jax.block_until_ready(gsa_layer_forward(x, params))
    ref = gsa_layer_reference(x, params)
    np.testing.assert_allclose(np.asarray(out), np.asarray(ref), rtol=2e-4, atol=2e-4)
    print("KERNEL_OK")
</pallas_src>

<mosaic_0001>
module attributes {stable_mosaic.version = 11 : i64} {
  func.func @_gsa_kernel(%arg0: i32, %arg1: memref<8x32xf32, #tpu.memory_space<vmem>>, %arg2: memref<1x32xf32, #tpu.memory_space<vmem>>, %arg3: memref<1x32xf32, #tpu.memory_space<vmem>>, %arg4: memref<32x96xf32, #tpu.memory_space<vmem>>, %arg5: memref<32x32xf32, #tpu.memory_space<vmem>>, %arg6: memref<64x16xf32, #tpu.memory_space<vmem>>, %arg7: memref<1x16xf32, #tpu.memory_space<vmem>>, %arg8: memref<1x16xf32, #tpu.memory_space<vmem>>, %arg9: memref<8x32xf32, #tpu.memory_space<vmem>>) attributes {dimension_semantics = [#tpu.dimension_semantics<parallel>], iteration_bounds = array<i64: 2>, scalar_prefetch = 0 : i64, scratch_operands = 0 : i64, tpu.core_type = #tpu.core_type<tc>, window_params = [{transform_indices = @transform_0, window_bounds = array<i64: 8, 32>}, {pipeline_mode = #tpu.pipeline_mode<synchronous>, transform_indices = @transform_1, window_bounds = array<i64: 1, 32>}, {pipeline_mode = #tpu.pipeline_mode<synchronous>, transform_indices = @transform_2, window_bounds = array<i64: 1, 32>}, {pipeline_mode = #tpu.pipeline_mode<synchronous>, transform_indices = @transform_3, window_bounds = array<i64: 32, 96>}, {pipeline_mode = #tpu.pipeline_mode<synchronous>, transform_indices = @transform_4, window_bounds = array<i64: 32, 32>}, {pipeline_mode = #tpu.pipeline_mode<synchronous>, transform_indices = @transform_5, window_bounds = array<i64: 64, 16>}, {pipeline_mode = #tpu.pipeline_mode<synchronous>, transform_indices = @transform_6, window_bounds = array<i64: 1, 16>}, {pipeline_mode = #tpu.pipeline_mode<synchronous>, transform_indices = @transform_7, window_bounds = array<i64: 1, 16>}, {transform_indices = @transform_8, window_bounds = array<i64: 8, 32>}]} {
    %c0 = arith.constant 0 : index
    %c0_0 = arith.constant 0 : index
    %0 = vector.load %arg1[%c0, %c0_0] : memref<8x32xf32, #tpu.memory_space<vmem>>, vector<8x32xf32>
    %cst = arith.constant dense<0.000000e+00> : vector<8xf32>
    %1 = vector.multi_reduction <add>, %0, %cst [1] : vector<8x32xf32> to vector<8xf32>
    %2 = vector.shape_cast %1 : vector<8xf32> to vector<8x1xf32>
    %cst_1 = arith.constant 3.200000e+01 : f32
    %3 = vector.broadcast %cst_1 : f32 to vector<8x1xf32>
    %4 = arith.divf %2, %3 : vector<8x1xf32>
    %5 = vector.broadcast %4 : vector<8x1xf32> to vector<8x32xf32>
    %6 = arith.subf %0, %5 : vector<8x32xf32>
    %7 = arith.mulf %6, %6 : vector<8x32xf32>
    %cst_2 = arith.constant dense<0.000000e+00> : vector<8xf32>
    %8 = vector.multi_reduction <add>, %7, %cst_2 [1] : vector<8x32xf32> to vector<8xf32>
    %9 = vector.shape_cast %8 : vector<8xf32> to vector<8x1xf32>
    %cst_3 = arith.constant 3.200000e+01 : f32
    %10 = vector.broadcast %cst_3 : f32 to vector<8x1xf32>
    %11 = arith.divf %9, %10 : vector<8x1xf32>
    %12 = vector.broadcast %4 : vector<8x1xf32> to vector<8x32xf32>
    %13 = arith.subf %0, %12 : vector<8x32xf32>
    %cst_4 = arith.constant 9.99999974E-6 : f32
    %14 = vector.broadcast %cst_4 : f32 to vector<8x1xf32>
    %15 = arith.addf %11, %14 : vector<8x1xf32>
    %16 = math.rsqrt %15 : vector<8x1xf32>
    %17 = vector.broadcast %16 : vector<8x1xf32> to vector<8x32xf32>
    %18 = arith.mulf %13, %17 : vector<8x32xf32>
    %c0_5 = arith.constant 0 : index
    %c0_6 = arith.constant 0 : index
    %19 = vector.load %arg2[%c0_5, %c0_6] : memref<1x32xf32, #tpu.memory_space<vmem>>, vector<1x32xf32>
    %20 = vector.broadcast %19 : vector<1x32xf32> to vector<8x32xf32>
    %21 = arith.mulf %18, %20 : vector<8x32xf32>
    %c0_7 = arith.constant 0 : index
    %c0_8 = arith.constant 0 : index
    %22 = vector.load %arg3[%c0_7, %c0_8] : memref<1x32xf32, #tpu.memory_space<vmem>>, vector<1x32xf32>
    %23 = vector.broadcast %22 : vector<1x32xf32> to vector<8x32xf32>
    %24 = arith.addf %21, %23 : vector<8x32xf32>
    %c0_9 = arith.constant 0 : index
    %c0_10 = arith.constant 0 : index
    %25 = vector.load %arg4[%c0_9, %c0_10] : memref<32x96xf32, #tpu.memory_space<vmem>>, vector<32x96xf32>
    %cst_11 = arith.constant dense<0.000000e+00> : vector<8x96xf32>
    %26 = tpu.matmul %24, %25, %cst_11 {dimension_numbers = #tpu.dot_dimension_numbers<[1], [0], [0], [1], [0, 0, 1, 1], [], []>} : vector<8x32xf32>, vector<32x96xf32>, vector<8x96xf32> -> vector<8x96xf32>
    %27 = vector.extract_strided_slice %26 {offsets = [0, 0], sizes = [8, 32], strides = [1, 1]} : vector<8x96xf32> to vector<8x32xf32>
    %28 = vector.extract_strided_slice %26 {offsets = [0, 32], sizes = [8, 32], strides = [1, 1]} : vector<8x96xf32> to vector<8x32xf32>
    %29 = vector.extract_strided_slice %26 {offsets = [0, 64], sizes = [8, 32], strides = [1, 1]} : vector<8x96xf32> to vector<8x32xf32>
    %30 = arith.mulf %27, %27 : vector<8x32xf32>
    %31 = tpu.concatenate %30, %27 in 1 : vector<8x32xf32>, vector<8x32xf32> -> vector<8x64xf32>
    %32 = arith.mulf %28, %28 : vector<8x32xf32>
    %33 = tpu.concatenate %32, %28 in 1 : vector<8x32xf32>, vector<8x32xf32> -> vector<8x64xf32>
    %34 = tpu.concatenate %31, %33 in 0 : vector<8x64xf32>, vector<8x64xf32> -> vector<16x64xf32>
    %c0_12 = arith.constant 0 : index
    %c0_13 = arith.constant 0 : index
    %35 = vector.load %arg6[%c0_12, %c0_13] : memref<64x16xf32, #tpu.memory_space<vmem>>, vector<64x16xf32>
    %cst_14 = arith.constant dense<0.000000e+00> : vector<16x16xf32>
    %36 = tpu.matmul %34, %35, %cst_14 {dimension_numbers = #tpu.dot_dimension_numbers<[1], [0], [0], [1], [0, 0, 1, 1], [], []>} : vector<16x64xf32>, vector<64x16xf32>, vector<16x16xf32> -> vector<16x16xf32>
    %37 = vector.extract_strided_slice %36 {offsets = [0, 0], sizes = [8, 16], strides = [1, 1]} : vector<16x16xf32> to vector<8x16xf32>
    %c0_15 = arith.constant 0 : index
    %c0_16 = arith.constant 0 : index
    %38 = vector.load %arg7[%c0_15, %c0_16] : memref<1x16xf32, #tpu.memory_space<vmem>>, vector<1x16xf32>
    %39 = vector.broadcast %38 : vector<1x16xf32> to vector<8x16xf32>
    %40 = arith.addf %37, %39 : vector<8x16xf32>
    %41 = math.exp %40 : vector<8x16xf32>
    %42 = vector.extract_strided_slice %36 {offsets = [8, 0], sizes = [8, 16], strides = [1, 1]} : vector<16x16xf32> to vector<8x16xf32>
    %c0_17 = arith.constant 0 : index
    %c0_18 = arith.constant 0 : index
    %43 = vector.load %arg8[%c0_17, %c0_18] : memref<1x16xf32, #tpu.memory_space<vmem>>, vector<1x16xf32>
    %44 = vector.broadcast %43 : vector<1x16xf32> to vector<8x16xf32>
    %45 = arith.addf %42, %44 : vector<8x16xf32>
    %46 = math.exp %45 : vector<8x16xf32>
    %47 = vector.shape_cast %41 : vector<8x16xf32> to vector<1x8x16xf32>
    %48 = vector.shape_cast %46 : vector<8x16xf32> to vector<1x8x16xf32>
    %49 = vector.shape_cast %29 : vector<8x32xf32> to vector<1x8x32xf32>
    %50 = vector.extract_strided_slice %47 {offsets = [0, 0, 0], sizes = [1, 8, 4], strides = [1, 1, 1]} : vector<1x8x16xf32> to vector<1x8x4xf32>
    %51 = vector.extract_strided_slice %48 {offsets = [0, 0, 0], sizes = [1, 8, 4], strides = [1, 1, 1]} : vector<1x8x16xf32> to vector<1x8x4xf32>
    "tpu.trace_start"() <{level = 10 : i32, message = "bqs,bks->bqk"}> : () -> ()
    %cst_19 = arith.constant dense<0.000000e+00> : vector<1x8x8xf32>
    %52 = tpu.matmul %50, %51, %cst_19 {dimension_numbers = #tpu.dot_dimension_numbers<[2], [2], [1], [1], [0, 0, 0, 1, 1, 1], [0], [0]>} : vector<1x8x4xf32>, vector<1x8x4xf32>, vector<1x8x8xf32> -> vector<1x8x8xf32>
    "tpu.trace_stop"() : () -> ()
    %cst_20 = arith.constant dense<0xFF800000> : vector<1x8xf32>
    %53 = vector.multi_reduction <maximumf>, %52, %cst_20 [2] : vector<1x8x8xf32> to vector<1x8xf32>
    %54 = vector.shape_cast %53 : vector<1x8xf32> to vector<1x8x1xf32>
    %55 = vector.broadcast %54 : vector<1x8x1xf32> to vector<1x8x8xf32>
    %56 = arith.subf %52, %55 : vector<1x8x8xf32>
    %57 = math.exp %56 : vector<1x8x8xf32>
    %cst_21 = arith.constant dense<0.000000e+00> : vector<1x8xf32>
    %58 = vector.multi_reduction <add>, %57, %cst_21 [2] : vector<1x8x8xf32> to vector<1x8xf32>
    %59 = vector.shape_cast %58 : vector<1x8xf32> to vector<1x8x1xf32>
    %60 = tpu.reciprocal %59 {approx = true} : vector<1x8x1xf32> -> vector<1x8x1xf32>
    %61 = vector.extract_strided_slice %49 {offsets = [0, 0, 0], sizes = [1, 8, 8], strides = [1, 1, 1]} : vector<1x8x32xf32> to vector<1x8x8xf32>
    "tpu.trace_start"() <{level = 10 : i32, message = "bqk,bkd->bqd"}> : () -> ()
    %cst_22 = arith.constant dense<0.000000e+00> : vector<1x8x8xf32>
    %62 = tpu.matmul %57, %61, %cst_22 {dimension_numbers = #tpu.dot_dimension_numbers<[2], [1], [1], [2], [0, 0, 0, 1, 1, 2], [0], [0]>} : vector<1x8x8xf32>, vector<1x8x8xf32>, vector<1x8x8xf32> -> vector<1x8x8xf32>
    "tpu.trace_stop"() : () -> ()
    %63 = vector.broadcast %60 : vector<1x8x1xf32> to vector<1x8x8xf32>
    %64 = arith.mulf %62, %63 : vector<1x8x8xf32>
    %65 = vector.extract_strided_slice %47 {offsets = [0, 0, 4], sizes = [1, 8, 4], strides = [1, 1, 1]} : vector<1x8x16xf32> to vector<1x8x4xf32>
    %66 = vector.extract_strided_slice %48 {offsets = [0, 0, 4], sizes = [1, 8, 4], strides = [1, 1, 1]} : vector<1x8x16xf32> to vector<1x8x4xf32>
    "tpu.trace_start"() <{level = 10 : i32, message = "bqs,bks->bqk"}> : () -> ()
    %cst_23 = arith.constant dense<0.000000e+00> : vector<1x8x8xf32>
    %67 = tpu.matmul %65, %66, %cst_23 {dimension_numbers = #tpu.dot_dimension_numbers<[2], [2], [1], [1], [0, 0, 0, 1, 1, 1], [0], [0]>} : vector<1x8x4xf32>, vector<1x8x4xf32>, vector<1x8x8xf32> -> vector<1x8x8xf32>
    "tpu.trace_stop"() : () -> ()
    %cst_24 = arith.constant dense<0xFF800000> : vector<1x8xf32>
    %68 = vector.multi_reduction <maximumf>, %67, %cst_24 [2] : vector<1x8x8xf32> to vector<1x8xf32>
    %69 = vector.shape_cast %68 : vector<1x8xf32> to vector<1x8x1xf32>
    %70 = vector.broadcast %69 : vector<1x8x1xf32> to vector<1x8x8xf32>
    %71 = arith.subf %67, %70 : vector<1x8x8xf32>
    %72 = math.exp %71 : vector<1x8x8xf32>
    %cst_25 = arith.constant dense<0.000000e+00> : vector<1x8xf32>
    %73 = vector.multi_reduction <add>, %72, %cst_25 [2] : vector<1x8x8xf32> to vector<1x8xf32>
    %74 = vector.shape_cast %73 : vector<1x8xf32> to vector<1x8x1xf32>
    %75 = tpu.reciprocal %74 {approx = true} : vector<1x8x1xf32> -> vector<1x8x1xf32>
    %76 = vector.extract_strided_slice %49 {offsets = [0, 0, 8], sizes = [1, 8, 8], strides = [1, 1, 1]} : vector<1x8x32xf32> to vector<1x8x8xf32>
    "tpu.trace_start"() <{level = 10 : i32, message = "bqk,bkd->bqd"}> : () -> ()
    %cst_26 = arith.constant dense<0.000000e+00> : vector<1x8x8xf32>
    %77 = tpu.matmul %72, %76, %cst_26 {dimension_numbers = #tpu.dot_dimension_numbers<[2], [1], [1], [2], [0, 0, 0, 1, 1, 2], [0], [0]>} : vector<1x8x8xf32>, vector<1x8x8xf32>, vector<1x8x8xf32> -> vector<1x8x8xf32>
    "tpu.trace_stop"() : () -> ()
    %78 = vector.broadcast %75 : vector<1x8x1xf32> to vector<1x8x8xf32>
    %79 = arith.mulf %77, %78 : vector<1x8x8xf32>
    %80 = vector.extract_strided_slice %47 {offsets = [0, 0, 8], sizes = [1, 8, 4], strides = [1, 1, 1]} : vector<1x8x16xf32> to vector<1x8x4xf32>
    %81 = vector.extract_strided_slice %48 {offsets = [0, 0, 8], sizes = [1, 8, 4], strides = [1, 1, 1]} : vector<1x8x16xf32> to vector<1x8x4xf32>
    "tpu.trace_start"() <{level = 10 : i32, message = "bqs,bks->bqk"}> : () -> ()
    %cst_27 = arith.constant dense<0.000000e+00> : vector<1x8x8xf32>
    %82 = tpu.matmul %80, %81, %cst_27 {dimension_numbers = #tpu.dot_dimension_numbers<[2], [2], [1], [1], [0, 0, 0, 1, 1, 1], [0], [0]>} : vector<1x8x4xf32>, vector<1x8x4xf32>, vector<1x8x8xf32> -> vector<1x8x8xf32>
    "tpu.trace_stop"() : () -> ()
    %cst_28 = arith.constant dense<0xFF800000> : vector<1x8xf32>
    %83 = vector.multi_reduction <maximumf>, %82, %cst_28 [2] : vector<1x8x8xf32> to vector<1x8xf32>
    %84 = vector.shape_cast %83 : vector<1x8xf32> to vector<1x8x1xf32>
    %85 = vector.broadcast %84 : vector<1x8x1xf32> to vector<1x8x8xf32>
    %86 = arith.subf %82, %85 : vector<1x8x8xf32>
    %87 = math.exp %86 : vector<1x8x8xf32>
    %cst_29 = arith.constant dense<0.000000e+00> : vector<1x8xf32>
    %88 = vector.multi_reduction <add>, %87, %cst_29 [2] : vector<1x8x8xf32> to vector<1x8xf32>
    %89 = vector.shape_cast %88 : vector<1x8xf32> to vector<1x8x1xf32>
    %90 = tpu.reciprocal %89 {approx = true} : vector<1x8x1xf32> -> vector<1x8x1xf32>
    %91 = vector.extract_strided_slice %49 {offsets = [0, 0, 16], sizes = [1, 8, 8], strides = [1, 1, 1]} : vector<1x8x32xf32> to vector<1x8x8xf32>
    "tpu.trace_start"() <{level = 10 : i32, message = "bqk,bkd->bqd"}> : () -> ()
    %cst_30 = arith.constant dense<0.000000e+00> : vector<1x8x8xf32>
    %92 = tpu.matmul %87, %91, %cst_30 {dimension_numbers = #tpu.dot_dimension_numbers<[2], [1], [1], [2], [0, 0, 0, 1, 1, 2], [0], [0]>} : vector<1x8x8xf32>, vector<1x8x8xf32>, vector<1x8x8xf32> -> vector<1x8x8xf32>
    "tpu.trace_stop"() : () -> ()
    %93 = vector.broadcast %90 : vector<1x8x1xf32> to vector<1x8x8xf32>
    %94 = arith.mulf %92, %93 : vector<1x8x8xf32>
    %95 = vector.extract_strided_slice %47 {offsets = [0, 0, 12], sizes = [1, 8, 4], strides = [1, 1, 1]} : vector<1x8x16xf32> to vector<1x8x4xf32>
    %96 = vector.extract_strided_slice %48 {offsets = [0, 0, 12], sizes = [1, 8, 4], strides = [1, 1, 1]} : vector<1x8x16xf32> to vector<1x8x4xf32>
    "tpu.trace_start"() <{level = 10 : i32, message = "bqs,bks->bqk"}> : () -> ()
    %cst_31 = arith.constant dense<0.000000e+00> : vector<1x8x8xf32>
    %97 = tpu.matmul %95, %96, %cst_31 {dimension_numbers = #tpu.dot_dimension_numbers<[2], [2], [1], [1], [0, 0, 0, 1, 1, 1], [0], [0]>} : vector<1x8x4xf32>, vector<1x8x4xf32>, vector<1x8x8xf32> -> vector<1x8x8xf32>
    "tpu.trace_stop"() : () -> ()
    %cst_32 = arith.constant dense<0xFF800000> : vector<1x8xf32>
    %98 = vector.multi_reduction <maximumf>, %97, %cst_32 [2] : vector<1x8x8xf32> to vector<1x8xf32>
    %99 = vector.shape_cast %98 : vector<1x8xf32> to vector<1x8x1xf32>
    %100 = vector.broadcast %99 : vector<1x8x1xf32> to vector<1x8x8xf32>
    %101 = arith.subf %97, %100 : vector<1x8x8xf32>
    %102 = math.exp %101 : vector<1x8x8xf32>
    %cst_33 = arith.constant dense<0.000000e+00> : vector<1x8xf32>
    %103 = vector.multi_reduction <add>, %102, %cst_33 [2] : vector<1x8x8xf32> to vector<1x8xf32>
    %104 = vector.shape_cast %103 : vector<1x8xf32> to vector<1x8x1xf32>
    %105 = tpu.reciprocal %104 {approx = true} : vector<1x8x1xf32> -> vector<1x8x1xf32>
    %106 = vector.extract_strided_slice %49 {offsets = [0, 0, 24], sizes = [1, 8, 8], strides = [1, 1, 1]} : vector<1x8x32xf32> to vector<1x8x8xf32>
    "tpu.trace_start"() <{level = 10 : i32, message = "bqk,bkd->bqd"}> : () -> ()
    %cst_34 = arith.constant dense<0.000000e+00> : vector<1x8x8xf32>
    %107 = tpu.matmul %102, %106, %cst_34 {dimension_numbers = #tpu.dot_dimension_numbers<[2], [1], [1], [2], [0, 0, 0, 1, 1, 2], [0], [0]>} : vector<1x8x8xf32>, vector<1x8x8xf32>, vector<1x8x8xf32> -> vector<1x8x8xf32>
    "tpu.trace_stop"() : () -> ()
    %108 = vector.broadcast %105 : vector<1x8x1xf32> to vector<1x8x8xf32>
    %109 = arith.mulf %107, %108 : vector<1x8x8xf32>
    %110 = tpu.concatenate %64, %79, %94, %109 in 2 : vector<1x8x8xf32>, vector<1x8x8xf32>, vector<1x8x8xf32>, vector<1x8x8xf32> -> vector<1x8x32xf32>
    %111 = vector.shape_cast %110 : vector<1x8x32xf32> to vector<8x32xf32>
    %c0_35 = arith.constant 0 : index
    %c0_36 = arith.constant 0 : index
    %112 = vector.load %arg5[%c0_35, %c0_36] : memref<32x32xf32, #tpu.memory_space<vmem>>, vector<32x32xf32>
    %cst_37 = arith.constant dense<0.000000e+00> : vector<8x32xf32>
    %113 = tpu.matmul %111, %112, %cst_37 {dimension_numbers = #tpu.dot_dimension_numbers<[1], [0], [0], [1], [0, 0, 1, 1], [], []>} : vector<8x32xf32>, vector<32x32xf32>, vector<8x32xf32> -> vector<8x32xf32>
    %114 = arith.addf %0, %113 : vector<8x32xf32>
    %c0_38 = arith.constant 0 : index
    %c0_39 = arith.constant 0 : index
    %115 = vector.load %arg9[%c0_38, %c0_39] : memref<8x32xf32, #tpu.memory_space<vmem>>, vector<8x32xf32>
    tpu.vector_store %arg9[%c0_38, %c0_39], %114 {strides = array<i32>} : memref<8x32xf32, #tpu.memory_space<vmem>>, vector<8x32xf32>,
    return
  }
  func.func @transform_0(%arg0: i32) -> (i32, i32) {
    %c0_i32 = arith.constant 0 : i32
    %c0_i32_0 = arith.constant 0 : i32
    return %arg0, %c0_i32 : i32, i32
  }
  func.func @transform_1(%arg0: i32) -> (i32, i32) {
    %c0_i32 = arith.constant 0 : i32
    %c0_i32_0 = arith.constant 0 : i32
    %c0_i32_1 = arith.constant 0 : i32
    return %c0_i32, %c0_i32_0 : i32, i32
  }
  func.func @transform_2(%arg0: i32) -> (i32, i32) {
    %c0_i32 = arith.constant 0 : i32
    %c0_i32_0 = arith.constant 0 : i32
    %c0_i32_1 = arith.constant 0 : i32
    return %c0_i32, %c0_i32_0 : i32, i32
  }
  func.func @transform_3(%arg0: i32) -> (i32, i32) {
    %c0_i32 = arith.constant 0 : i32
    %c0_i32_0 = arith.constant 0 : i32
    %c0_i32_1 = arith.constant 0 : i32
    return %c0_i32, %c0_i32_0 : i32, i32
  }
  func.func @transform_4(%arg0: i32) -> (i32, i32) {
    %c0_i32 = arith.constant 0 : i32
    %c0_i32_0 = arith.constant 0 : i32
    %c0_i32_1 = arith.constant 0 : i32
    return %c0_i32, %c0_i32_0 : i32, i32
  }
  func.func @transform_5(%arg0: i32) -> (i32, i32) {
    %c0_i32 = arith.constant 0 : i32
    %c0_i32_0 = arith.constant 0 : i32
    %c0_i32_1 = arith.constant 0 : i32
    return %c0_i32, %c0_i32_0 : i32, i32
  }
  func.func @transform_6(%arg0: i32) -> (i32, i32) {
    %c0_i32 = arith.constant 0 : i32
    %c0_i32_0 = arith.constant 0 : i32
    %c0_i32_1 = arith.constant 0 : i32
    return %c0_i32, %c0_i32_0 : i32, i32
  }
  func.func @transform_7(%arg0: i32) -> (i32, i32) {
    %c0_i32 = arith.constant 0 : i32
    %c0_i32_0 = arith.constant 0 : i32
    %c0_i32_1 = arith.constant 0 : i32
    return %c0_i32, %c0_i32_0 : i32, i32
  }
  func.func @transform_8(%arg0: i32) -> (i32, i32) {
    %c0_i32 = arith.constant 0 : i32
    %c0_i32_0 = arith.constant 0 : i32
    return %arg0, %c0_i32 : i32, i32
  }
}

</mosaic_0001>

<bundles_post_ra>
// kernel: tpu_custom_call.1
= control target key start
LH: loop header
LB: loop body
LE: loop exit
PB: predicated region body
PF: predicated region fallthrough
CT: control target
= control target key end

     0   :  { %13 = vsyncpa [#allocation3], 0  ;;  %s1308_s0 = inlined_call_operand.vmem [shape: f32[16,32], index: 0, kind: input, shape index: {}]   ;;  %s1309_s1 = inlined_call_operand.hbm [shape: f32[1,32], index: 1, kind: input, shape index: {}]   ;;  %s1310_s2 = inlined_call_operand.vmem [shape: f32[1,32], index: 2, kind: input, shape index: {}]   ;;  %s1311_s3 = inlined_call_operand.vmem [shape: f32[32,96], index: 3, kind: input, shape index: {}]   ;;  %s1312_s4 = inlined_call_operand.vmem [shape: f32[32,32], index: 4, kind: input, shape index: {}]   ;;  %s1313_s5 = inlined_call_operand.vmem [shape: f32[64,16], index: 5, kind: input, shape index: {}]   ;;  %s1314_s6 = inlined_call_operand.vmem [shape: f32[1,16], index: 6, kind: input, shape index: {}]   ;;  %s1315_s7 = inlined_call_operand.vmem [shape: f32[1,16], index: 7, kind: input, shape index: {}]   ;;  %s1316_s8 = inlined_call_operand.hbm [shape: f32[16,32], index: 8, kind: output, shape index: {}]  }
   0x1   :  { %14 = vsyncpa [#allocation4], 0 }
   0x2   :  { %16 = vsyncpa [#allocation4 + $0x1], 0  ;;  %s1116_s27 = smov 0   ;;  %s1118_s28 = smov 0  }
   0x3   :  { %s1120_s29 = smov 0   ;;  %s1122_s30 = smov 0  }
   0x4 LB: > { %s1137_s9 = sadd.s32 4294967295, %s1055_s30   ;;  %s840_s10 = sadd.s32 4294967294, %s1055_s30   ;;  %s1055_s30 = sphi %s1122_s30, %s1322_s30   ;;  %s1051_s29 = sphi %s1120_s29, %s1321_s29   ;;  %s1047_s28 = sphi %s1118_s28, %s1320_s28   ;;  %s1043_s27 = sphi %s1116_s27, %s1319_s27  }
   0x5   : > { %s1141_s11 = sadd.s32 1, %s1055_s30   ;;  %s202_s12 = sadd.s32 1, %s1051_s29 }
   0x6   : > { %s199_s13 = ssub.s32 %s1055_s30, %s1141_s11  ;;  %p212_p0 = scmp.ne.s32.totalorder %s1051_s29, %s1047_s28 }
   0x7   : > { %p200_p1 = scmp.eq.s32.totalorder %s199_s13, 0  ;;  %p213_p2 = scmp.eq.s32.totalorder %s1137_s9, 1 }
   0x8   : > { %p218_p3 = scmp.ne.s32.totalorder %s1047_s28, %s1043_s27  ;;  %p219_p4 = scmp.eq.s32.totalorder %s840_s10, 1 }
   0x9   : > { %s1152_s14 = scalar_select %p200_p1, %s1051_s29, %s202_s12  }
   0xa   : > { %p1154_p5 = por %p213_p2, %p212_p0  ;;  %p1158_p6 = por %p219_p4, %p218_p3 }
   0xb   : > { %p841_p7 = scmp.ge.s32.totalorder %s1055_s30, 1  ;;  %p226_p8 = scmp.lt.s32.totalorder %s1055_s30, 3 }
   0xc   : > { %p882_p9 = scmp.eq.s32.totalorder %s1137_s9, 0  ;;  %s238_s19 = sshll.u32 %s1309_s1, 4  ;;  %s239_s19 = int_to_ptr.hbm [resolvable:$true] %s238_s19 }
   0xd   : > { %p227_p10 = pnand %p841_p7, %p226_p8  ;;  %s1057_s20 = smov [#allocation2]  }
   0xe   : > { %s240_s21 = sshll.u32 %s1057_s20, 4  ;;  %s241_s21 = int_to_ptr.vmem [resolvable:$true] %s240_s21 }
   0xf   : > { %p874_p11 = pneg %p227_p10  ;;  %278 = sbr.rel (%p227_p10) target bundleno = 1839 (0x72f), region = 52 }
  0x11   : > { %p875_p12 = pnand %p882_p9, %p874_p11 }
  0x13   : > { %877 = dma.hbm_to_vmem [thread:$0]  (!%p875_p12), %s239_s19, 16, %s241_s21, [#allocation3]  }
  0x14   : > { %1034 = dma.done.wait (%p882_p9), [#allocation3], 16  }
  0x15   : > { %1036 = vsyncadd (%p882_p9), [#allocation3], 4294967280  ;;  %p312_p13 = scmp.lt.s32.totalorder %s1137_s9, 1  ;;  %vm317_vm0 = vcmask 261120   ;;  %v1058_v2 = vmov 32.0   ;;  %v360_v14 = vld [vmem:[%s1311_s3 + $0x18] sm:$0xff] }
  0x16   : > { %935 = vrcp.f32 %v1058_v2  ;;  %376 = vmatpush.msra.mxu0 %v360_v14  ;;  %v359_v15 = vld [vmem:[%s1311_s3 + $0x10] sm:$0xff]  ;;  %v358_v16 = vld [vmem:[%s1311_s3 + $0x8] sm:$0xff]  ;;  %v357_v17 = vld [vmem:[%s1311_s3] sm:$0xff]  ;;  %s1059_s25 = smov 32   ;;  %vm403_vm5 = vcmask 523264   ;;  %s1061_s20 = smov 124  }
  0x17   : > { %s313_s22 = scalar_select %p312_p13, %s1137_s9, 1  ;;  %v931_v27 = vld [vmem:[#allocation2] ss:$0 sm:$0xff]  ;;  %v402_v33 = vld [vmem:[%s1313_s5 + $0x38] sm:$0xff]  ;;  %v401_v34 = vld [vmem:[%s1313_s5 + $0x30] sm:$0xff]  ;;  %vm447_vm6 = vcmask 31744  }
  0x18   : > { %377 = vmatpush.msra.mxu0 %v359_v15  ;;  %v932_v30 = vld [vmem:[%s1310_s2] ss:$0 sm:$0xff]  ;;  %418 = vmatpush.msra.mxu1 %v402_v33  ;;  %v400_v35 = vld [vmem:[%s1313_s5 + $0x28] sm:$0xff]  ;;  %v398_v37 = vld [vmem:[%s1313_s5 + $0x18] sm:$0xff]  ;;  %s1062_s21 = smov 120   ;;  %vm474_vm7 = vcmask 64512  }
  0x19   : > { %s847_s23 = sshll.u32 %s313_s22, 3  ;;  %v399_v36 = vld [vmem:[%s1313_s5 + $0x20] sm:$0xff]  ;;  %v397_v38 = vld [vmem:[%s1313_s5 + $0x10] sm:$0xff]  ;;  %v396_v39 = vld [vmem:[%s1313_s5 + $0x8] sm:$0xff]  ;;  %s1063_s22 = smov 64   ;;  %vm720_vm8 = vcmask 130048  }
  0x1a   : > { %s315_s26 = scalar_lea.vmem %s1308_s0, %s847_s23  ;;  %378 = vmatpush.msra.mxu0 %v358_v16  ;;  %419 = vmatpush.msra.mxu1 %v401_v34  ;;  %v395_v42 = vld [vmem:[%s1313_s5] sm:$0xff]  ;;  %s1064_s23 = smov 56   ;;  %vm722_vm9 = vcmask 195584  }
  0x1b   : > { %v1173_v0 = vld [vmem:[%s315_s26] sm:$0xff]  ;;  %s1060_s26 = smov 96   ;;  %s1065_s24 = smov 116  }
  0x1c   : > { %v318_v1 = vsel %vm317_vm0, %v1173_v0, 0.0  ;;  %v936_v3 = vpop.eup %935  ;;  %379 = vmatpush.msra.mxu0 %v357_v17  ;;  %420 = vmatpush.msra.mxu1 %v400_v35  ;;  %v933_v47 = vld [vmem:[%s1314_s6] ss:$0 sm:$0xff]  ;;  %s1068_s10 = smov 8   ;;  %s1069_s12 = smov 16  }
  0x1d   : > { %319 = vadd.xlane.f32.xlu0 %v318_v1  ;;  %v322_v4 = vmul.f32 32.0, %v936_v3  ;;  %vm326_vm1 = vweird.f32 %v936_v3  ;;  %v934_v51 = vld [vmem:[%s1315_s7] ss:$0 sm:$0xff] }
  0x1e   : > { %421 = vmatpush.msra.mxu1 %v399_v36 }
  0x1f   : > { %v323_v5 = vsub.f32 1.0, %v322_v4 }
  0x20   : > { %422 = vmatpush.msra.mxu1 %v398_v37 }
  0x21   : > { %v324_v6 = vmul.f32 %v936_v3, %v323_v5 }
  0x22   : > { %423 = vmatpush.msra.mxu1 %v397_v38 }
  0x23   : > { %v325_v7 = vadd.f32 %v936_v3, %v324_v6 }
  0x24   : > { %424 = vmatpush.msra.mxu1 %v396_v39 }
  0x25   : > { %v327_v8 = vsel %vm326_vm1, %v936_v3, %v325_v7 }
  0x26   : > { %425 = vmatpush.msra.mxu1 %v395_v42  ;;  %v726_v42 = vld [vmem:[%s1312_s4 + $0x10] sm:$0xff] }
  0x90   : > { %v320_v9 = vpop.xlane.xlu0 %319 }
  0x91   : > { %v328_v10 = vmul.f32 %v327_v8, %v320_v9 }
  0x93   : > { %v329_v11 = vsub.f32 %v1173_v0, %v328_v10 }
  0x95   : > { %v330_v12 = vmul.f32 %v329_v11, %v329_v11 }
  0x97   : > { %v331_v13 = vsel %vm317_vm0, %v330_v12, 0.0 }
  0x98   : > { %332 = vadd.xlane.f32.xlu0 %v331_v13 }
 0x10b   : > { %v333_v18 = vpop.xlane.xlu0 %332 }
 0x10c   : > { %v334_v19 = vmul.f32 %v333_v18, %v327_v8 }
 0x10e   : > { %v335_v20 = vadd.f32 1e-05, %v334_v19 }
 0x110   : > { %937 = vrsqrt.f32 %v335_v20  ;;  %vm342_vm3 = vweird.f32 %v335_v20 }
 0x116   : > { %v938_v21 = vpop.eup %937 }
 0x117   : > { %v337_v22 = vmul.f32 %v938_v21, %v335_v20  ;;  %vm343_vm2 = vweird.f32 %v938_v21 }
 0x118   : > { %vm344_vm4 = vmor %vm342_vm3, %vm343_vm2 }
 0x119   : > { %v338_v23 = vmul.f32 %v938_v21, %v337_v22 }
 0x11b   : > { %v339_v24 = vmul.f32 0.5, %v338_v23 }
 0x11d   : > { %v340_v25 = vsub.f32 1.5, %v339_v24 }
 0x11f   : > { %v341_v26 = vmul.f32 %v938_v21, %v340_v25 }
 0x121   : > { %v345_v28 = vsel %vm344_vm4, %v938_v21, %v341_v26 }
 0x122   : > { %v346_v29 = vmul.f32 %v345_v28, %v329_v11 }
 0x124   : > { %v351_v31 = vmul.f32 %v931_v27, %v346_v29 }
 0x126   : > { %v356_v32 = vadd.f32 %v932_v30, %v351_v31 }
 0x128   : > { %848 = vmatmul.msk.f32.vlgmr.msra.gmra.mxu0 %vm317_vm0, %v356_v32 }
 0x1a5   : > { %v1216_v40 = vpop.f32.mrf.mxu0 }
 0x1a6   : > { %386 = vrot.lane.b32.xlu1 %v1216_v40, %s1059_s25  ;;  %v384_v41 = vmul.f32 %v1216_v40, %v1216_v40  ;;  %s1066_s25 = smov 48  }
 0x1ae   : > { %391 = vrot.lane.b32.xlu1 %v384_v41, %s1060_s26  ;;  %s1067_s26 = smov 40  }
 0x218   : > { %v387_v43 = vpop.permute.xlu1 %386 }
 0x219   : > { %v389_v44 = vsel %vm317_vm0, %v384_v41, %v387_v43  ;;  %v727_v41 = vld [vmem:[%s1312_s4 + $0x18] sm:$0xff]  ;;  %v725_v43 = vld [vmem:[%s1312_s4 + $0x8] sm:$0xff] }
 0x21a   : > { %849 = vmatmul.msk.f32.vlgmr.msra.gmra.mxu1 %vm403_vm5, %v389_v44  ;;  %v724_v44 = vld [vmem:[%s1312_s4] sm:$0xff] }
 0x220   : > { %v392_v45 = vpop.permute.xlu1 %391 }
 0x221   : > { %v394_v46 = vsel %vm317_vm0, %v392_v45, %v1216_v40 }
 0x222   : > { %850 = vmatmul.msk.f32.gmra.mxu1 %vm403_vm5, %v394_v46 }
 0x297   : > { %v427_v48 = vpop.f32.mrf.mxu1 }
 0x298   : > { %v437_v49 = vadd.f32 %v933_v47, %v427_v48 }
 0x29a   : > { %v438_v50 = vmul.f32 1.442695, %v437_v49 }
 0x29c   : > { %939 = vpow2.f32 %v438_v50 }
 0x29f   : > { %v430_v52 = vpop.f32.mrf.mxu1 }
 0x2a0   : > { %v444_v53 = vadd.f32 %v934_v51, %v430_v52 }
 0x2a2   : > { %v940_v54 = vpop.eup %939  ;;  %v445_v55 = vmul.f32 1.442695, %v444_v53 }
 0x2a3   : > { %512 = vrot.lane.b32.xlu1 %v940_v54, %s1061_s20 }
 0x2a4   : > { %941 = vpow2.f32 %v445_v55 }
 0x2aa   : > { %v942_v56 = vpop.eup %941 }
 0x2ab   : > { %514 = vrot.lane.b32.xlu0 %v942_v56, %s1061_s20  ;;  %851 = vmatpush.xpose.msk.msra.mxu2 %vm447_vm6, %v942_v56 }
 0x2ae   : > { %852 = vmatmul.msk.f32.vlgmr.msra.gmra.mxu2 %vm447_vm6, %v940_v54 }
 0x2b3   : > { %579 = vrot.lane.b32.xlu0 %v942_v56, %s1062_s21 }
 0x2bb   : > { %577 = vrot.lane.b32.xlu0 %v940_v54, %s1062_s21 }
 0x315   : > { %v513_v7 = vpop.permute.xlu1 %512 }
 0x31d   : > { %v515_v57 = vpop.permute.xlu0 %514 }
 0x325   : > { %v580_v58 = vpop.permute.xlu0 %579 }
 0x326   : > { %857 = vmatpush.xpose.msk.msrb.mxu0 %vm447_vm6, %v580_v58 }
 0x32d   : > { %v578_v59 = vpop.permute.xlu0 %577 }
 0x32e   : > { %858 = vmatmul.msk.f32.vlgmr.msrb.gmra.mxu0 %vm447_vm6, %v578_v59 }
 0x331   : > { %v471_v60 = vpop.f32.mrf.mxu2 }
 0x332   : > { %v475_v61 = vsel %vm474_vm7, %v471_v60, -inf }
 0x333   : > { %476 = vmax.xlane.f32.xlu2 %v475_v61 }
 0x34b   : > { %485 = vrot.lane.b32.xlu2 %v1216_v40, %s1063_s22 }
 0x353   : > { %550 = vrot.lane.b32.xlu2 %v1216_v40, %s1064_s23 }
 0x35b   : > { %644 = vrot.lane.b32.xlu2 %v942_v56, %s1065_s24 }
 0x363   : > { %642 = vrot.lane.b32.xlu2 %v940_v54, %s1065_s24  ;;  %s1070_s24 = smov 24  }
 0x3a6   : > { %v477_v62 = vpop.xlane.xlu2 %476 }
 0x3a7   : > { %v478_v63 = vsub.f32 %v471_v60, %v477_v62 }
 0x3a9   : > { %v479_v1 = vmul.f32 1.442695, %v478_v63 }
 0x3ab   : > { %943 = vpow2.f32 %v479_v1  ;;  %v602_v2 = vpop.f32.mrf.mxu0 }
 0x3ac   : > { %v605_v3 = vsel %vm474_vm7, %v602_v2, -inf }
 0x3ad   : > { %606 = vmax.xlane.f32.xlu0 %v605_v3 }
 0x3ae   : > { %v486_v4 = vpop.permute.xlu2 %485 }
 0x3af   : > { %506 = vmatpush.msra.mxu3 %v486_v4 }
 0x3b1   : > { %854 = vmatpush.xpose.msk.msrb.mxu3 %vm447_vm6, %v515_v57  ;;  %v944_v5 = vpop.eup %943 }
 0x3b2   : > { %853 = vmatmul.msk.f32.vlgmr.msra.gmra.mxu3 %vm474_vm7, %v944_v5  ;;  %v481_v21 = vsel %vm474_vm7, %v944_v5, 0.0 }
 0x3b6   : > { %v551_v6 = vpop.permute.xlu2 %550 }
 0x3b7   : > { %571 = vmatpush.msrb.mxu2 %v551_v6 }
 0x3ba   : > { %855 = vmatmul.msk.f32.vlgmr.msrb.gmra.mxu3 %vm447_vm6, %v513_v7 }
 0x3be   : > { %v645_v8 = vpop.permute.xlu2 %644 }
 0x3bf   : > { %860 = vmatpush.xpose.msk.msra.mxu2 %vm447_vm6, %v645_v8 }
 0x3c6   : > { %v643_v20 = vpop.permute.xlu2 %642 }
 0x420   : > { %v607_v15 = vpop.xlane.xlu0 %606 }
 0x421   : > { %v608_v17 = vsub.f32 %v602_v2, %v607_v15 }
 0x423   : > { %v609_v19 = vmul.f32 1.442695, %v608_v17 }
 0x435   : > { %v1245_v9 = vpop.f32.mrf.mxu3 }
 0x43d   : > { %v537_v10 = vpop.f32.mrf.mxu3 }
 0x43e   : > { %v540_v11 = vsel %vm474_vm7, %v537_v10, -inf }
 0x43f   : > { %541 = vmax.xlane.f32.xlu1 %v540_v11 }
 0x458   : > { %615 = vrot.lane.b32.xlu1 %v1216_v40, %s1066_s25  ;;  %s309_s25 = sand.u32 1, %s1047_s28  }
 0x459   : > { %s754_s21 = scalar_lea.sflag [#allocation4], %s309_s25 }
 0x460   : > { %680 = vrot.lane.b32.xlu1 %v1216_v40, %s1067_s26  ;;  %s846_s26 = sshll.u32 %s309_s25, 3 }
 0x461   : > { %s311_s18 = scalar_lea.vmem [#allocation5], %s846_s26  ;;  %s1009_s26 = scalar_lea.hbm %s1316_s8, 16 }
 0x462   : > { %s766_s19 = sshll.u32 %s311_s18, 4  ;;  %s767_s19 = int_to_ptr.vmem [resolvable:$true] %s766_s19 }
 0x4b2   : > { %v542_v12 = vpop.xlane.xlu1 %541 }
 0x4b3   : > { %v543_v13 = vsub.f32 %v537_v10, %v542_v12 }
 0x4b5   : > { %v544_v14 = vmul.f32 1.442695, %v543_v13 }
 0x4b7   : > { %945 = vpow2.f32 %v544_v14 }
 0x4b8   : > { %947 = vpow2.f32 %v609_v19 }
 0x4bd   : > { %v946_v16 = vpop.eup %945 }
 0x4be   : > { %856 = vmatmul.msk.f32.vlgmr.msrb.gmra.mxu2 %vm474_vm7, %v946_v16  ;;  %v546_v18 = vsel %vm474_vm7, %v946_v16, 0.0  ;;  %v948_v23 = vpop.eup %947 }
 0x4bf   : > { %547 = vadd.xlane.f32.xlu0 %v546_v18  ;;  %v611_v28 = vsel %vm474_vm7, %v948_v23, 0.0 }
 0x4c6   : > { %861 = vmatmul.msk.f32.vlgmr.msra.gmra.mxu2 %vm447_vm6, %v643_v20 }
 0x4c7   : > { %482 = vadd.xlane.f32.xlu0 %v481_v21 }
 0x4ca   : > { %v616_v22 = vpop.permute.xlu1 %615 }
 0x4cb   : > { %636 = vmatpush.msra.mxu3 %v616_v22 }
 0x4cc   : > { %859 = vmatmul.msk.f32.vlgmr.msra.gmra.mxu3 %vm474_vm7, %v948_v23 }
 0x4cd   : > { %743 = vmatpush.msrb.mxu3 %v727_v41 }
 0x4cf   : > { %744 = vmatpush.msrb.mxu3 %v726_v42 }
 0x4d1   : > { %745 = vmatpush.msrb.mxu3 %v725_v43 }
 0x4d2   : > { %v681_v24 = vpop.permute.xlu1 %680 }
 0x4d3   : > { %701 = vmatpush.msra.mxu0 %v681_v24  ;;  %746 = vmatpush.msrb.mxu3 %v724_v44 }
 0x532   : > { %v548_v29 = vpop.xlane.xlu0 %547 }
 0x533   : > { %949 = vrcp.f32 %v548_v29 }
 0x539   : > { %v950_v30 = vpop.eup %949 }
 0x53a   : > { %v483_v49 = vpop.xlane.xlu0 %482 }
 0x541   : > { %v573_v25 = vpop.f32.mrf.mxu2 }
 0x542   : > { %v576_v31 = vmul.f32 %v950_v30, %v573_v25 }
 0x549   : > { %v667_v26 = vpop.f32.mrf.mxu2 }
 0x54a   : > { %v670_v27 = vsel %vm474_vm7, %v667_v26, -inf }
 0x54b   : > { %671 = vmax.xlane.f32.xlu2 %v670_v27 }
 0x54f   : > { %v638_v39 = vpop.f32.mrf.mxu3 }
 0x553   : > { %612 = vadd.xlane.f32.xlu2 %v611_v28 }
 0x56b   : > { %708 = vrot.lane.b32.xlu2 %v576_v31, %s1068_s10  ;;  %s865_s10 = sshll.u32 %s1137_s9, 3 }
 0x56c   : > { %s764_s17 = scalar_lea.hbm %s1316_s8, %s865_s10 }
 0x56d   : > { %s768_s20 = sshll.u32 %s764_s17, 4  ;;  %s769_s20 = int_to_ptr.hbm [resolvable:$true] %s768_s20 }
 0x56e   : > { %s1003_s22 = sshra.s32 %s769_s20, 4  ;;  %s1004_s22 = int_to_ptr.hbm [resolvable:$true] %s1003_s22 }
 0x56f   : > { %s1005_s23 = scalar_lea.hbm %s1004_s22, 8  ;;  %p1010_p3 = scmp.lt.s32.totalorder %s1004_s22, %s1316_s8 }
 0x570   : > { %p1006_p0 = scmp.ne.s32.totalorder %s1004_s22, %s1005_s23  ;;  %p1011_p4 = scmp.lt.s32.totalorder %s1009_s26, %s1005_s23 }
 0x572   : > { %p1007_p1 = pnand %p1006_p0, %p1154_p5  ;;  %p1012_p7 = por %p1011_p4, %p1010_p3 }
 0x574   : > { %p1008_p2 = pneg %p1007_p1 }
 0x576   : > { %p1013_p8 = pnand %p1012_p7, %p1008_p2 }
 0x5be   : > { %v672_v32 = vpop.xlane.xlu2 %671 }
 0x5bf   : > { %v673_v33 = vsub.f32 %v667_v26, %v672_v32 }
 0x5c1   : > { %v674_v34 = vmul.f32 1.442695, %v673_v33 }
 0x5c3   : > { %951 = vpow2.f32 %v674_v34 }
 0x5c6   : > { %v613_v35 = vpop.xlane.xlu2 %612 }
 0x5c7   : > { %953 = vrcp.f32 %v613_v35 }
 0x5c9   : > { %v952_v36 = vpop.eup %951 }
 0x5ca   : > { %862 = vmatmul.msk.f32.vlgmr.msra.gmra.mxu0 %vm474_vm7, %v952_v36  ;;  %v676_v37 = vsel %vm474_vm7, %v952_v36, 0.0 }
 0x5cb   : > { %677 = vadd.xlane.f32.xlu1 %v676_v37 }
 0x5cd   : > { %v954_v38 = vpop.eup %953 }
 0x5ce   : > { %v641_v40 = vmul.f32 %v954_v38, %v638_v39  ;;  %v709_v50 = vpop.permute.xlu2 %708 }
 0x5d0   : > { %712 = vrot.lane.b32.xlu0 %v641_v40, %s1069_s12 }
 0x63e   : > { %v678_v45 = vpop.xlane.xlu1 %677 }
 0x63f   : > { %955 = vrcp.f32 %v678_v45 }
 0x640   : > { %957 = vrcp.f32 %v483_v49 }
 0x642   : > { %v713_v53 = vpop.permute.xlu0 %712 }
 0x645   : > { %v956_v46 = vpop.eup %955 }
 0x646   : > { %v958_v51 = vpop.eup %957 }
 0x647   : > { %v703_v47 = vpop.f32.mrf.mxu0  ;;  %v511_v52 = vmul.f32 %v958_v51, %v1245_v9 }
 0x648   : > { %v706_v48 = vmul.f32 %v956_v46, %v703_v47 }
 0x649   : > { %v719_v54 = vsel %vm474_vm7, %v511_v52, %v709_v50 }
 0x64a   : > { %716 = vrot.lane.b32.xlu2 %v706_v48, %s1070_s24  ;;  %v721_v55 = vsel %vm720_vm8, %v719_v54, %v713_v53 }
 0x6a4   : > { %v717_v56 = vpop.permute.xlu2 %716 }
 0x6a5   : > { %v723_v57 = vsel %vm722_vm9, %v721_v55, %v717_v56 }
 0x6a6   : > { %863 = vmatmul.msk.f32.vlgmr.msrb.gmra.mxu3 %vm317_vm0, %v723_v57 }
 0x729   : > { %v748_v58 = vpop.f32.mrf.mxu3 }
 0x72a   : > { %v751_v59 = vadd.f32 %v748_v58, %v1173_v0 }
 0x72c   : > { %752 = vst.msk [vmem:[%s311_s18] sm:$0xff] %vm317_vm0, %v751_v59 }
 0x72d   : > { %1016 = shalt.err (!%p1013_p8)
}
 0x72e   : > { %872 = dma.vmem_to_hbm [thread:$0]  (%p1154_p5), %s767_s19, 128, %s769_s20, %s754_s21  }
 0x72f PF: > { %p884_p9 = scmp.ge.s32.totalorder %s1055_s30, 2  ;;  %s780_s25 = sand.u32 1, %s1043_s27  }
 0x730   : > { %s781_s13 = scalar_lea.sflag [#allocation4], %s780_s25 }
 0x731   : > { %p879_p10 = pnand %p884_p9, %p1158_p6 }
 0x733   : > { %p880_p11 = pneg %p879_p10 }
 0x735   : > { %1038 = dma.done.wait (%p880_p11), %s781_s13, 128  }
 0x736   : > { %1040 = vsyncadd (%p880_p11), %s781_s13, 4294967168  ;;  %p19_p12 = scmp.ge.s32.totalorder %s1141_s11, 4   ;;  %s1319_s27 = smov %s1047_s28 }
 0x737   : > { %s1320_s28 = smov %s1051_s29  ;;  %s1321_s29 = smov %s1152_s14 }
 0x738   : > { %s1322_s30 = smov %s1141_s11  ;;  %21 = sbr.rel (!%p19_p12) target bundleno = 4 (0x4), region = 92 }
 0x73d   :  { %787 = vsyncpa [#allocation3], 1 }
 0x73e   :  { %789 = vsyncpa [#allocation3 + $0x1], 1 }
 0x73f   :  { %790 = vsyncpa [#allocation4], 1 }
 0x740   :  { %792 = vsyncpa [#allocation4 + $0x1], 1 }

</bundles_post_ra>
